<compile_context>
chip_gen: v6e
topology: v6e:2x2x1
jax: 0.10.0
libtpu: 0.0.40
codegen_flags: <defaults>
</compile_context>

<pallas_src>
import functools
import math

import jax
import jax.numpy as jnp
from jax.experimental import pallas as pl
from jax.experimental.pallas import tpu as pltpu


def _round_up(v, m):
    return (v + m - 1) // m * m


# ---------------------------------------------------------------------------
# Fused Pallas kernel: all layers + head in one launch
# ---------------------------------------------------------------------------
def _mpgnn_fused_kernel(adj_hbm, x_ref, pool_ref, w_self_ref, w_nbr_ref,
                        w_pred_ref, b_pred_ref, out_ref,
                        adj_vmem, adj_sem, hid_ref, xw_ref, *, num_layers):
    f32 = jnp.float32
    bf16 = jnp.bfloat16
    n_mp = max(num_layers - 2, 0)   # layers that actually need the adjacency

    # Kick off the (large) adjacency DMA immediately so it overlaps with the
    # x @ W_self matmul and layer 0 below.  Skipped entirely (trace time) when
    # no layer consumes adj.
    if n_mp > 0:
        adj_cp = pltpu.make_async_copy(adj_hbm, adj_vmem, adj_sem)
        adj_cp.start()

    # Hoisted loop-invariant self-transform: x @ W_self, computed exactly once
    # (f32) and kept resident in VMEM scratch for reuse by every layer.
    xw_ref[...] = jnp.dot(x_ref[...], w_self_ref[...], preferred_element_type=f32)

    if num_layers >= 2:
        # Layer 0: hidden == 0 -> tanh(0)=0 -> A@0=0 -> tanh(0)=0, so the whole
        # aggregation path vanishes and hidden = relu(x @ W_self).
        hid_ref[...] = jnp.maximum(xw_ref[...], 0.0)
    else:
        hid_ref[...] = jnp.zeros_like(hid_ref)

    if n_mp > 0:
        # Only now do we need adj in VMEM.
        adj_cp.wait()

        def layer(_i, carry):
            # message(): tanh of neighbor hidden, cast to bf16 for the MXU.
            msg = jnp.tanh(hid_ref[...]).astype(bf16)
            # aggr='add' over incoming edges == A @ msg (bf16 x bf16, f32 acc).
            agg = jnp.dot(adj_vmem[...], msg, preferred_element_type=f32)
            agg = jnp.tanh(agg).astype(bf16)
            pre = xw_ref[...] + jnp.dot(agg, w_nbr_ref[...],
                                        preferred_element_type=f32)
            # conv's internal relu + the outer F.relu in MPGNN.forward
            # (idempotent); F.dropout(training=False) is identity.
            hid_ref[...] = jnp.maximum(pre, 0.0)
            return carry

        if n_mp <= 4:
            # Short fixed trip count -> unroll for scheduler visibility.
            for _ in range(n_mp):
                layer(0, 0)
        else:
            # Deep GNNs: avoid code-size blowup; state lives in hid_ref anyway.
            jax.lax.fori_loop(0, n_mp, layer, 0)

    # Head: global_mean_pool (dense P @ h) -> pred_head Linear -> log_softmax.
    pooled = jnp.dot(pool_ref[...], hid_ref[...], preferred_element_type=f32)
    logits = (jnp.dot(pooled, w_pred_ref[...], preferred_element_type=f32)
              + b_pred_ref[...])
    m = jnp.max(logits, axis=-1, keepdims=True)
    z = logits - m
    lse = jnp.log(jnp.sum(jnp.exp(z), axis=-1, keepdims=True))
    out_ref[...] = z - lse


# ---------------------------------------------------------------------------
# Wrapper: pad to TPU-friendly shapes, single pallas_call, slice result
# ---------------------------------------------------------------------------
def mpgnn_forward(x, adj, pool_mat, params, *, num_layers):
    N, C = x.shape
    H = params["w_nbr"].shape[0]
    O = params["w_pred"].shape[1]
    G = pool_mat.shape[0]

    # Lane dims -> multiples of 128, sublane-only dims -> multiples of 8.
    # Zero padding is exact:
    #   * padded hidden cols stay 0 (w_self/w_nbr padded cols are 0),
    #   * padded nodes stay 0 and never reach pooling (pool padded cols are 0),
    #   * padded logit lanes get bias -1e30 -> exp()==0 under log_softmax.
    Np = _round_up(N, 128)
    Cp = _round_up(C, 128)
    Hp = _round_up(H, 128)
    Op = _round_up(O, 128)
    Gp = _round_up(G, 8)

    def pad2(a, rows, cols, dtype=jnp.float32):
        a = a.astype(jnp.float32)
        a = jnp.pad(a, ((0, rows - a.shape[0]), (0, cols - a.shape[1])))
        return a.astype(dtype)

    # adj entries are small integer edge counts -> exact in bf16; the per-layer
    # bf16 matmuls dominate the flop count, everything executed once stays f32.
    adj_p    = pad2(adj, Np, Np, jnp.bfloat16)
    x_p      = pad2(x, Np, Cp)
    pool_p   = pad2(pool_mat, Gp, Np)
    w_self_p = pad2(params["w_self"], Cp, Hp)
    w_nbr_p  = pad2(params["w_nbr"], Hp, Hp, jnp.bfloat16)
    w_pred_p = pad2(params["w_pred"], Hp, Op)
    b        = params["b_pred"].astype(jnp.float32).reshape(1, O)
    b_pred_p = jnp.full((1, Op), -1e30, jnp.float32).at[:, :O].set(b)

    def full(shape):
        return pl.BlockSpec(shape, lambda i: tuple(0 for _ in shape))

    # VMEM budget: single-buffered adj landing scratch + persistent hid/xw
    # scratch + double-buffered small pipelined inputs/output + headroom.
    def nbytes(shape, dt):
        return math.prod(shape) * jnp.dtype(dt).itemsize

    vmem_need = (
        nbytes((Np, Np), jnp.bfloat16)                        # adj scratch (1x)
        + 2 * nbytes((Np, Hp), jnp.float32)                   # hid + xw scratch
        + 2 * (nbytes((Np, Cp), jnp.float32)                  # pipelined bufs (2x)
               + nbytes((Gp, Np), jnp.float32)
               + nbytes((Cp, Hp), jnp.float32)
               + nbytes((Hp, Hp), jnp.bfloat16)
               + nbytes((Hp, Op), jnp.float32)
               + nbytes((8, Op), jnp.float32)
               + nbytes((Gp, Op), jnp.float32)))
    vmem_limit = int(min(max(int(vmem_need * 1.5) + (4 << 20), 32 << 20),
                         100 << 20))

    out_p = pl.pallas_call(
        functools.partial(_mpgnn_fused_kernel, num_layers=num_layers),
        out_shape=jax.ShapeDtypeStruct((Gp, Op), jnp.float32),
        grid=(1,),
        in_specs=[pl.BlockSpec(memory_space=pl.ANY),  # adj: manual DMA, 1 buffer
                  full((Np, Cp)),   # x
                  full((Gp, Np)),   # pool matrix
                  full((Cp, Hp)),   # W_self
                  full((Hp, Hp)),   # W_nbr (bf16)
                  full((Hp, Op)),   # W_pred
                  full((1, Op))],   # b_pred
        out_specs=full((Gp, Op)),
        scratch_shapes=[pltpu.VMEM((Np, Np), jnp.bfloat16),   # adj landing buffer
                        pltpu.SemaphoreType.DMA(()),          # adj DMA completion
                        pltpu.VMEM((Np, Hp), jnp.float32),    # hidden (persistent)
                        pltpu.VMEM((Np, Hp), jnp.float32)],   # cached x @ W_self
        compiler_params=pltpu.CompilerParams(
            dimension_semantics=("arbitrary",),
            vmem_limit_bytes=vmem_limit),
    )(adj_p, x_p, pool_p, w_self_p, w_nbr_p, w_pred_p, b_pred_p)

    return out_p[:G, :O]


# ---------------------------------------------------------------------------
# Pure-JAX f32 reference (for correctness sanity check)
# ---------------------------------------------------------------------------
def mpgnn_reference(x, adj, pool_mat, params, *, num_layers):
    N = x.shape[0]
    H = params["w_nbr"].shape[0]
    hidden = jnp.zeros((N, H), jnp.float32)
    for _ in range(num_layers - 1):
        agg = jnp.tanh(adj @ jnp.tanh(hidden))
        hidden = jnp.maximum(x @ params["w_self"] + agg @ params["w_nbr"], 0.0)
    logits = (pool_mat @ hidden) @ params["w_pred"] + params["b_pred"]
    return jax.nn.log_softmax(logits, axis=-1)


# ---------------------------------------------------------------------------
# Driver
# ---------------------------------------------------------------------------
if __name__ == "__main__":
    key = jax.random.PRNGKey(0)
    k_x, k_src, k_dst, k_ws, k_wn, k_wp, k_bp = jax.random.split(key, 7)

    # Small shapes consistent with the module's forward.
    N, E, G = 16, 48, 2                 # nodes, edges, graphs
    IN_CH, HID, OUT_CH = 8, 32, 4
    NUM_LAYERS = 3                      # -> 2 message-passing layers

    # Node features.
    x = jax.random.normal(k_x, (N, IN_CH), dtype=jnp.float32)

    # edge_index -> dense adjacency (A[i, j] = #edges j->i, source_to_target flow).
    src = jax.random.randint(k_src, (E,), 0, N)
    dst = jax.random.randint(k_dst, (E,), 0, N)
    adj = jnp.zeros((N, N), jnp.float32).at[dst, src].add(1.0)

    # batch vector -> mean-pool matrix P [G, N].
    batch = jnp.concatenate(
        [jnp.zeros(N // 2, jnp.int32), jnp.ones(N - N // 2, jnp.int32)])
    onehot = (batch[None, :] == jnp.arange(G)[:, None]).astype(jnp.float32)
    counts = jnp.maximum(onehot.sum(axis=1, keepdims=True), 1.0)
    pool_mat = onehot / counts

    # Deterministic parameter init (PyTorch Linear-style uniform(-1/sqrt(fan_in), ...)).
    def uniform(k, shape, fan_in):
        b = 1.0 / jnp.sqrt(jnp.float32(fan_in))
        return jax.random.uniform(k, shape, jnp.float32, -b, b)

    params = {
        "w_self": uniform(k_ws, (IN_CH, HID), IN_CH),   # lin_self.weight.T
        "w_nbr":  uniform(k_wn, (HID, HID), HID),       # lin_nbr.weight.T
        "w_pred": uniform(k_wp, (HID, OUT_CH), HID),    # pred_head.weight.T
        "b_pred": uniform(k_bp, (1, OUT_CH), HID),      # pred_head.bias
    }

    fwd = jax.jit(functools.partial(mpgnn_forward, num_layers=NUM_LAYERS))
    out = jax.block_until_ready(fwd(x, adj, pool_mat, params))

    ref = mpgnn_reference(x, adj, pool_mat, params, num_layers=NUM_LAYERS)
    assert out.shape == (G, OUT_CH)
    # bf16 MXU operands with f32 accumulation -> compare against the exact-f32
    # reference at bf16-level tolerance.
    assert jnp.allclose(out, ref, atol=7e-2, rtol=7e-2), (out, ref)

    # TODO(synk): dropout is only implemented for inference (training=False);
    # training-mode dropout would need pltpu.prng_* inside the kernel.
    print("KERNEL_OK")
</pallas_src>

<mosaic_0001>
module attributes {stable_mosaic.version = 11 : i64} {
  func.func @_mpgnn_fused_kernel(%arg0: i32, %arg1: memref<128x128xbf16, #tpu.memory_space<any>>, %arg2: memref<128x128xf32, #tpu.memory_space<vmem>>, %arg3: memref<8x128xf32, #tpu.memory_space<vmem>>, %arg4: memref<128x128xf32, #tpu.memory_space<vmem>>, %arg5: memref<128x128xbf16, #tpu.memory_space<vmem>>, %arg6: memref<128x128xf32, #tpu.memory_space<vmem>>, %arg7: memref<1x128xf32, #tpu.memory_space<vmem>>, %arg8: memref<8x128xf32, #tpu.memory_space<vmem>>, %arg9: memref<128x128xbf16, #tpu.memory_space<vmem>>, %arg10: memref<!tpu.dma_semaphore, #tpu.memory_space<semaphore_mem>>, %arg11: memref<128x128xf32, #tpu.memory_space<vmem>>, %arg12: memref<128x128xf32, #tpu.memory_space<vmem>>) attributes {dimension_semantics = [#tpu.dimension_semantics<arbitrary>], iteration_bounds = array<i64: 1>, scalar_prefetch = 0 : i64, scratch_operands = 4 : i64, tpu.core_type = #tpu.core_type<tc>, window_params = [{}, {pipeline_mode = #tpu.pipeline_mode<synchronous>, transform_indices = @transform_1, window_bounds = array<i64: 128, 128>}, {pipeline_mode = #tpu.pipeline_mode<synchronous>, transform_indices = @transform_2, window_bounds = array<i64: 8, 128>}, {pipeline_mode = #tpu.pipeline_mode<synchronous>, transform_indices = @transform_3, window_bounds = array<i64: 128, 128>}, {pipeline_mode = #tpu.pipeline_mode<synchronous>, transform_indices = @transform_4, window_bounds = array<i64: 128, 128>}, {pipeline_mode = #tpu.pipeline_mode<synchronous>, transform_indices = @transform_5, window_bounds = array<i64: 128, 128>}, {pipeline_mode = #tpu.pipeline_mode<synchronous>, transform_indices = @transform_6, window_bounds = array<i64: 1, 128>}, {pipeline_mode = #tpu.pipeline_mode<synchronous>, transform_indices = @transform_7, window_bounds = array<i64: 8, 128>}]} {
    tpu.enqueue_dma source(%arg1 : memref<128x128xbf16, #tpu.memory_space<any>>) target(%arg9 : memref<128x128xbf16, #tpu.memory_space<vmem>>) target_semaphore(%arg10 : memref<!tpu.dma_semaphore, #tpu.memory_space<semaphore_mem>>)
    %c0 = arith.constant 0 : index
    %c0_0 = arith.constant 0 : index
    %0 = vector.load %arg2[%c0, %c0_0] : memref<128x128xf32, #tpu.memory_space<vmem>>, vector<128x128xf32>
    %c0_1 = arith.constant 0 : index
    %c0_2 = arith.constant 0 : index
    %1 = vector.load %arg4[%c0_1, %c0_2] : memref<128x128xf32, #tpu.memory_space<vmem>>, vector<128x128xf32>
    %cst = arith.constant dense<0.000000e+00> : vector<128x128xf32>
    %2 = tpu.matmul %0, %1, %cst {dimension_numbers = #tpu.dot_dimension_numbers<[1], [0], [0], [1], [0, 0, 1, 1], [], []>} : vector<128x128xf32>, vector<128x128xf32>, vector<128x128xf32> -> vector<128x128xf32>
    %c0_3 = arith.constant 0 : index
    %c0_4 = arith.constant 0 : index
    %3 = vector.load %arg12[%c0_3, %c0_4] : memref<128x128xf32, #tpu.memory_space<vmem>>, vector<128x128xf32>
    tpu.vector_store %arg12[%c0_3, %c0_4], %2 {strides = array<i32>} : memref<128x128xf32, #tpu.memory_space<vmem>>, vector<128x128xf32>,
    %c0_5 = arith.constant 0 : index
    %c0_6 = arith.constant 0 : index
    %4 = vector.load %arg12[%c0_5, %c0_6] : memref<128x128xf32, #tpu.memory_space<vmem>>, vector<128x128xf32>
    %cst_7 = arith.constant 0.000000e+00 : f32
    %5 = vector.broadcast %cst_7 : f32 to vector<128x128xf32>
    %6 = arith.maximumf %4, %5 : vector<128x128xf32>
    %c0_8 = arith.constant 0 : index
    %c0_9 = arith.constant 0 : index
    %7 = vector.load %arg11[%c0_8, %c0_9] : memref<128x128xf32, #tpu.memory_space<vmem>>, vector<128x128xf32>
    tpu.vector_store %arg11[%c0_8, %c0_9], %6 {strides = array<i32>} : memref<128x128xf32, #tpu.memory_space<vmem>>, vector<128x128xf32>,
    tpu.wait_dma2 semaphore(%arg10 : memref<!tpu.dma_semaphore, #tpu.memory_space<semaphore_mem>>) src(%arg1 : memref<128x128xbf16, #tpu.memory_space<any>>) dst(%arg9 : memref<128x128xbf16, #tpu.memory_space<vmem>>)
    %c0_10 = arith.constant 0 : index
    %c0_11 = arith.constant 0 : index
    %8 = vector.load %arg11[%c0_10, %c0_11] : memref<128x128xf32, #tpu.memory_space<vmem>>, vector<128x128xf32>
    %9 = math.tanh %8 : vector<128x128xf32>
    %10 = arith.truncf %9 : vector<128x128xf32> to vector<128x128xbf16>
    %c0_12 = arith.constant 0 : index
    %c0_13 = arith.constant 0 : index
    %11 = vector.load %arg9[%c0_12, %c0_13] : memref<128x128xbf16, #tpu.memory_space<vmem>>, vector<128x128xbf16>
    %cst_14 = arith.constant dense<0.000000e+00> : vector<128x128xf32>
    %12 = tpu.matmul %11, %10, %cst_14 {dimension_numbers = #tpu.dot_dimension_numbers<[1], [0], [0], [1], [0, 0, 1, 1], [], []>} : vector<128x128xbf16>, vector<128x128xbf16>, vector<128x128xf32> -> vector<128x128xf32>
    %13 = math.tanh %12 : vector<128x128xf32>
    %14 = arith.truncf %13 : vector<128x128xf32> to vector<128x128xbf16>
    %c0_15 = arith.constant 0 : index
    %c0_16 = arith.constant 0 : index
    %15 = vector.load %arg12[%c0_15, %c0_16] : memref<128x128xf32, #tpu.memory_space<vmem>>, vector<128x128xf32>
    %c0_17 = arith.constant 0 : index
    %c0_18 = arith.constant 0 : index
    %16 = vector.load %arg5[%c0_17, %c0_18] : memref<128x128xbf16, #tpu.memory_space<vmem>>, vector<128x128xbf16>
    %cst_19 = arith.constant dense<0.000000e+00> : vector<128x128xf32>
    %17 = tpu.matmul %14, %16, %cst_19 {dimension_numbers = #tpu.dot_dimension_numbers<[1], [0], [0], [1], [0, 0, 1, 1], [], []>} : vector<128x128xbf16>, vector<128x128xbf16>, vector<128x128xf32> -> vector<128x128xf32>
    %18 = arith.addf %15, %17 : vector<128x128xf32>
    %cst_20 = arith.constant 0.000000e+00 : f32
    %19 = vector.broadcast %cst_20 : f32 to vector<128x128xf32>
    %20 = arith.maximumf %18, %19 : vector<128x128xf32>
    %c0_21 = arith.constant 0 : index
    %c0_22 = arith.constant 0 : index
    %21 = vector.load %arg11[%c0_21, %c0_22] : memref<128x128xf32, #tpu.memory_space<vmem>>, vector<128x128xf32>
    tpu.vector_store %arg11[%c0_21, %c0_22], %20 {strides = array<i32>} : memref<128x128xf32, #tpu.memory_space<vmem>>, vector<128x128xf32>,
    %c0_23 = arith.constant 0 : index
    %c0_24 = arith.constant 0 : index
    %22 = vector.load %arg3[%c0_23, %c0_24] : memref<8x128xf32, #tpu.memory_space<vmem>>, vector<8x128xf32>
    %c0_25 = arith.constant 0 : index
    %c0_26 = arith.constant 0 : index
    %23 = vector.load %arg11[%c0_25, %c0_26] : memref<128x128xf32, #tpu.memory_space<vmem>>, vector<128x128xf32>
    %cst_27 = arith.constant dense<0.000000e+00> : vector<8x128xf32>
    %24 = tpu.matmul %22, %23, %cst_27 {dimension_numbers = #tpu.dot_dimension_numbers<[1], [0], [0], [1], [0, 0, 1, 1], [], []>} : vector<8x128xf32>, vector<128x128xf32>, vector<8x128xf32> -> vector<8x128xf32>
    %c0_28 = arith.constant 0 : index
    %c0_29 = arith.constant 0 : index
    %25 = vector.load %arg6[%c0_28, %c0_29] : memref<128x128xf32, #tpu.memory_space<vmem>>, vector<128x128xf32>
    %cst_30 = arith.constant dense<0.000000e+00> : vector<8x128xf32>
    %26 = tpu.matmul %24, %25, %cst_30 {dimension_numbers = #tpu.dot_dimension_numbers<[1], [0], [0], [1], [0, 0, 1, 1], [], []>} : vector<8x128xf32>, vector<128x128xf32>, vector<8x128xf32> -> vector<8x128xf32>
    %c0_31 = arith.constant 0 : index
    %c0_32 = arith.constant 0 : index
    %27 = vector.load %arg7[%c0_31, %c0_32] : memref<1x128xf32, #tpu.memory_space<vmem>>, vector<1x128xf32>
    %28 = vector.broadcast %27 : vector<1x128xf32> to vector<8x128xf32>
    %29 = arith.addf %26, %28 : vector<8x128xf32>
    %cst_33 = arith.constant dense<0xFF800000> : vector<8xf32>
    %30 = vector.multi_reduction <maximumf>, %29, %cst_33 [1] : vector<8x128xf32> to vector<8xf32>
    %31 = vector.shape_cast %30 : vector<8xf32> to vector<8x1xf32>
    %32 = vector.broadcast %31 : vector<8x1xf32> to vector<8x128xf32>
    %33 = arith.subf %29, %32 : vector<8x128xf32>
    %34 = math.exp %33 : vector<8x128xf32>
    %cst_34 = arith.constant dense<0.000000e+00> : vector<8xf32>
    %35 = vector.multi_reduction <add>, %34, %cst_34 [1] : vector<8x128xf32> to vector<8xf32>
    %36 = vector.shape_cast %35 : vector<8xf32> to vector<8x1xf32>
    %37 = math.log %36 : vector<8x1xf32>
    %38 = vector.broadcast %37 : vector<8x1xf32> to vector<8x128xf32>
    %39 = arith.subf %33, %38 : vector<8x128xf32>
    %c0_35 = arith.constant 0 : index
    %c0_36 = arith.constant 0 : index
    %40 = vector.load %arg8[%c0_35, %c0_36] : memref<8x128xf32, #tpu.memory_space<vmem>>, vector<8x128xf32>
    tpu.vector_store %arg8[%c0_35, %c0_36], %39 {strides = array<i32>} : memref<8x128xf32, #tpu.memory_space<vmem>>, vector<8x128xf32>,
    return
  }
  func.func @transform_1(%arg0: i32) -> (i32, i32) {
    %c0_i32 = arith.constant 0 : i32
    %c0_i32_0 = arith.constant 0 : i32
    %c0_i32_1 = arith.constant 0 : i32
    return %c0_i32, %c0_i32_0 : i32, i32
  }
  func.func @transform_2(%arg0: i32) -> (i32, i32) {
    %c0_i32 = arith.constant 0 : i32
    %c0_i32_0 = arith.constant 0 : i32
    %c0_i32_1 = arith.constant 0 : i32
    return %c0_i32, %c0_i32_0 : i32, i32
  }
  func.func @transform_3(%arg0: i32) -> (i32, i32) {
    %c0_i32 = arith.constant 0 : i32
    %c0_i32_0 = arith.constant 0 : i32
    %c0_i32_1 = arith.constant 0 : i32
    return %c0_i32, %c0_i32_0 : i32, i32
  }
  func.func @transform_4(%arg0: i32) -> (i32, i32) {
    %c0_i32 = arith.constant 0 : i32
    %c0_i32_0 = arith.constant 0 : i32
    %c0_i32_1 = arith.constant 0 : i32
    return %c0_i32, %c0_i32_0 : i32, i32
  }
  func.func @transform_5(%arg0: i32) -> (i32, i32) {
    %c0_i32 = arith.constant 0 : i32
    %c0_i32_0 = arith.constant 0 : i32
    %c0_i32_1 = arith.constant 0 : i32
    return %c0_i32, %c0_i32_0 : i32, i32
  }
  func.func @transform_6(%arg0: i32) -> (i32, i32) {
    %c0_i32 = arith.constant 0 : i32
    %c0_i32_0 = arith.constant 0 : i32
    %c0_i32_1 = arith.constant 0 : i32
    return %c0_i32, %c0_i32_0 : i32, i32
  }
  func.func @transform_7(%arg0: i32) -> (i32, i32) {
    %c0_i32 = arith.constant 0 : i32
    %c0_i32_0 = arith.constant 0 : i32
    %c0_i32_1 = arith.constant 0 : i32
    return %c0_i32, %c0_i32_0 : i32, i32
  }
}

</mosaic_0001>

<bundles_post_ra>
// kernel: mpgnn_forward.1
= control target key start
LH: loop header
LB: loop body
LE: loop exit
PB: predicated region body
PF: predicated region fallthrough
CT: control target
= control target key end

     0   :  { %s1728_s0 = inlined_call_operand.vmem [shape: bf16[128,128], index: 0, kind: input, shape index: {}]   ;;  %s1729_s1 = inlined_call_operand.vmem [shape: f32[128,128], index: 1, kind: input, shape index: {}]   ;;  %s1730_s2 = inlined_call_operand.vmem [shape: f32[8,128], index: 2, kind: input, shape index: {}]   ;;  %s1731_s3 = inlined_call_operand.vmem [shape: f32[128,128], index: 3, kind: input, shape index: {}]   ;;  %s1732_s4 = inlined_call_operand.vmem [shape: bf16[128,128], index: 4, kind: input, shape index: {}]   ;;  %s1733_s5 = inlined_call_operand.vmem [shape: f32[128,128], index: 5, kind: input, shape index: {}]   ;;  %s1734_s6 = inlined_call_operand.vmem [shape: f32[1,128], index: 6, kind: input, shape index: {}]   ;;  %s1735_s7 = inlined_call_operand.vmem [shape: f32[8,128], index: 7, kind: output, shape index: {}]  }
   0x1   :  { %v58_v0 = vld [vmem:[%s1728_s0] sm:$0xff]  ;;  %v60_v1 = vld [vmem:[%s1728_s0 + $0x8] sm:$0xff]  ;;  %v62_v2 = vld [vmem:[%s1728_s0 + $0x10] sm:$0xff] }
   0x2   :  { %59 = vst [vmem:[#allocation2] sm:$0xff] %v58_v0  ;;  %61 = vst [vmem:[#allocation2 + $0x8] sm:$0xff] %v60_v1  ;;  %v64_v3 = vld [vmem:[%s1728_s0 + $0x18] sm:$0xff]  ;;  %v66_v4 = vld [vmem:[%s1728_s0 + $0x20] sm:$0xff] }
   0x3   :  { %63 = vst [vmem:[#allocation2 + $0x10] sm:$0xff] %v62_v2  ;;  %v68_v5 = vld [vmem:[%s1728_s0 + $0x28] sm:$0xff]  ;;  %65 = vst [vmem:[#allocation2 + $0x18] sm:$0xff] %v64_v3  ;;  %v70_v6 = vld [vmem:[%s1728_s0 + $0x30] sm:$0xff] }
   0x4   :  { %67 = vst [vmem:[#allocation2 + $0x20] sm:$0xff] %v66_v4  ;;  %69 = vst [vmem:[#allocation2 + $0x28] sm:$0xff] %v68_v5  ;;  %v72_v7 = vld [vmem:[%s1728_s0 + $0x38] sm:$0xff] }
   0x5   :  { %71 = vst [vmem:[#allocation2 + $0x30] sm:$0xff] %v70_v6  ;;  %73 = vst [vmem:[#allocation2 + $0x38] sm:$0xff] %v72_v7 }
   0x6   :  { %81 = vsyncadd [#allocation3], 1024  ;;  %v113_v8 = vld [vmem:[%s1731_s3 + $0x78] sm:$0xff]  ;;  %v112_v9 = vld [vmem:[%s1731_s3 + $0x70] sm:$0xff] }
   0x7   :  { %1102 = vmatprep.subr.mxu0 %v113_v8  ;;  %v111_v10 = vld [vmem:[%s1731_s3 + $0x68] sm:$0xff]  ;;  %v110_v11 = vld [vmem:[%s1731_s3 + $0x60] sm:$0xff]  ;;  %v109_v13 = vld [vmem:[%s1731_s3 + $0x58] sm:$0xff] }
   0x8   :  { %1103 = vmatpush3.msra.mxu0 %v113_v8  ;;  %v82_v12 = vld [vmem:[%s1729_s1] sm:$0xff]  ;;  %v108_v14 = vld [vmem:[%s1731_s3 + $0x50] sm:$0xff]  ;;  %v107_v15 = vld [vmem:[%s1731_s3 + $0x48] sm:$0xff] }
   0x9   :  { %1104 = vmatprep.subr.mxu0 %v112_v9  ;;  %1134 = vmatprep.mubr.f32.mxu0 %v82_v12  ;;  %v106_v16 = vld [vmem:[%s1731_s3 + $0x40] sm:$0xff]  ;;  %v105_v17 = vld [vmem:[%s1731_s3 + $0x38] sm:$0xff]  ;;  %v104_v18 = vld [vmem:[%s1731_s3 + $0x30] sm:$0xff] }
   0xa   :  { %1105 = vmatpush3.msra.mxu0 %v112_v9  ;;  %v103_v19 = vld [vmem:[%s1731_s3 + $0x28] sm:$0xff]  ;;  %v102_v20 = vld [vmem:[%s1731_s3 + $0x20] sm:$0xff]  ;;  %v101_v21 = vld [vmem:[%s1731_s3 + $0x18] sm:$0xff] }
   0xb   :  { %1106 = vmatprep.subr.mxu0 %v111_v10  ;;  %v100_v22 = vld [vmem:[%s1731_s3 + $0x10] sm:$0xff]  ;;  %v99_v23 = vld [vmem:[%s1731_s3 + $0x8] sm:$0xff]  ;;  %v98_v24 = vld [vmem:[%s1731_s3] sm:$0xff] }
   0xc   :  { %1107 = vmatpush3.msra.mxu0 %v111_v10  ;;  %v83_v25 = vld [vmem:[%s1729_s1 + $0x8] sm:$0xff]  ;;  %v84_v26 = vld [vmem:[%s1729_s1 + $0x10] sm:$0xff]  ;;  %v85_v27 = vld [vmem:[%s1729_s1 + $0x18] sm:$0xff] }
   0xd   :  { %1108 = vmatprep.subr.mxu0 %v110_v11  ;;  %v86_v28 = vld [vmem:[%s1729_s1 + $0x20] sm:$0xff]  ;;  %v87_v29 = vld [vmem:[%s1729_s1 + $0x28] sm:$0xff]  ;;  %v88_v30 = vld [vmem:[%s1729_s1 + $0x30] sm:$0xff] }
   0xe   :  { %1109 = vmatpush3.msra.mxu0 %v110_v11  ;;  %v89_v31 = vld [vmem:[%s1729_s1 + $0x38] sm:$0xff]  ;;  %v90_v32 = vld [vmem:[%s1729_s1 + $0x40] sm:$0xff]  ;;  %v91_v33 = vld [vmem:[%s1729_s1 + $0x48] sm:$0xff] }
   0xf   :  { %1110 = vmatprep.subr.mxu0 %v109_v13  ;;  %v92_v34 = vld [vmem:[%s1729_s1 + $0x50] sm:$0xff]  ;;  %v93_v35 = vld [vmem:[%s1729_s1 + $0x58] sm:$0xff]  ;;  %v94_v36 = vld [vmem:[%s1729_s1 + $0x60] sm:$0xff] }
  0x10   :  { %1111 = vmatpush3.msra.mxu0 %v109_v13  ;;  %v95_v37 = vld [vmem:[%s1729_s1 + $0x68] sm:$0xff]  ;;  %v96_v38 = vld [vmem:[%s1729_s1 + $0x70] sm:$0xff]  ;;  %v97_v39 = vld [vmem:[%s1729_s1 + $0x78] sm:$0xff] }
  0x11   :  { %1112 = vmatprep.subr.mxu0 %v108_v14 }
  0x12   :  { %1113 = vmatpush3.msra.mxu0 %v108_v14 }
  0x13   :  { %1114 = vmatprep.subr.mxu0 %v107_v15 }
  0x14   :  { %1115 = vmatpush3.msra.mxu0 %v107_v15 }
  0x15   :  { %1116 = vmatprep.subr.mxu0 %v106_v16 }
  0x16   :  { %1117 = vmatpush3.msra.mxu0 %v106_v16 }
  0x17   :  { %1118 = vmatprep.subr.mxu0 %v105_v17 }
  0x18   :  { %1119 = vmatpush3.msra.mxu0 %v105_v17 }
  0x19   :  { %1120 = vmatprep.subr.mxu0 %v104_v18 }
  0x1a   :  { %1121 = vmatpush3.msra.mxu0 %v104_v18 }
  0x1b   :  { %1122 = vmatprep.subr.mxu0 %v103_v19 }
  0x1c   :  { %1123 = vmatpush3.msra.mxu0 %v103_v19 }
  0x1d   :  { %1124 = vmatprep.subr.mxu0 %v102_v20 }
  0x1e   :  { %1125 = vmatpush3.msra.mxu0 %v102_v20 }
  0x1f   :  { %1126 = vmatprep.subr.mxu0 %v101_v21 }
  0x20   :  { %1127 = vmatpush3.msra.mxu0 %v101_v21 }
  0x21   :  { %1128 = vmatprep.subr.mxu0 %v100_v22 }
  0x22   :  { %1129 = vmatpush3.msra.mxu0 %v100_v22 }
  0x23   :  { %1130 = vmatprep.subr.mxu0 %v99_v23 }
  0x24   :  { %1131 = vmatpush3.msra.mxu0 %v99_v23 }
  0x25   :  { %1132 = vmatprep.subr.mxu0 %v98_v24 }
  0x26   :  { %1133 = vmatpush3.msra.mxu0 %v98_v24 }
  0x27   :  { %1135 = vmatmul.mubr.f32.vlgmr.msra.gmra.mxu0 %v83_v25 }
  0x28   :  { %1137 = vmatprep.mubr.f32.mxu0 %v84_v26 }
  0x2b   :  { %1138 = vmatmul.mubr.f32.gmra.mxu0 %v85_v27 }
  0x2c   :  { %1140 = vmatprep.mubr.f32.mxu0 %v86_v28 }
  0x2f   :  { %1141 = vmatmul.mubr.f32.gmra.mxu0 %v87_v29 }
  0x30   :  { %1143 = vmatprep.mubr.f32.mxu0 %v88_v30 }
  0x33   :  { %1144 = vmatmul.mubr.f32.gmra.mxu0 %v89_v31 }
  0x34   :  { %1146 = vmatprep.mubr.f32.mxu0 %v90_v32 }
  0x37   :  { %1147 = vmatmul.mubr.f32.gmra.mxu0 %v91_v33 }
  0x38   :  { %1149 = vmatprep.mubr.f32.mxu0 %v92_v34 }
  0x3b   :  { %1150 = vmatmul.mubr.f32.gmra.mxu0 %v93_v35 }
  0x3c   :  { %1152 = vmatprep.mubr.f32.mxu0 %v94_v36 }
  0x3f   :  { %1153 = vmatmul.mubr.f32.gmra.mxu0 %v95_v37 }
  0x40   :  { %1155 = vmatprep.mubr.f32.mxu0 %v96_v38 }
  0x43   :  { %1156 = vmatmul.mubr.f32.gmra.mxu0 %v97_v39 }
  0xe7   :  { %v1542_v40 = vpop.f32.mrf.mxu0 }
  0xe8   :  { %v292_v41 = vmax.f32 %v1542_v40, 0.0 }
  0xe9   :  { %v1545_v42 = vpop.f32.mrf.mxu0 }
  0xea   :  { %v291_v43 = vmax.f32 %v1545_v42, 0.0 }
  0xeb   :  { %v1548_v44 = vpop.f32.mrf.mxu0 }
  0xec   :  { %v294_v45 = vmax.f32 %v1548_v44, 0.0 }
  0xed   :  { %v1551_v46 = vpop.f32.mrf.mxu0 }
  0xee   :  { %v293_v47 = vmax.f32 %v1551_v46, 0.0 }
  0xef   :  { %v1554_v48 = vpop.f32.mrf.mxu0 }
  0xf0   :  { %v296_v49 = vmax.f32 %v1554_v48, 0.0 }
  0xf1   :  { %v1557_v50 = vpop.f32.mrf.mxu0 }
  0xf2   :  { %v295_v51 = vmax.f32 %v1557_v50, 0.0 }
  0xf3   :  { %v1560_v52 = vpop.f32.mrf.mxu0 }
  0xf4   :  { %v298_v53 = vmax.f32 %v1560_v52, 0.0 }
  0xf5   :  { %v1563_v54 = vpop.f32.mrf.mxu0 }
  0xf6   :  { %v297_v55 = vmax.f32 %v1563_v54, 0.0 }
  0xf7   :  { %v1566_v56 = vpop.f32.mrf.mxu0 }
  0xf8   :  { %v300_v57 = vmax.f32 %v1566_v56, 0.0 }
  0xf9   :  { %v1569_v58 = vpop.f32.mrf.mxu0 }
  0xfa   :  { %v299_v59 = vmax.f32 %v1569_v58, 0.0 }
  0xfb   :  { %v1572_v60 = vpop.f32.mrf.mxu0 }
  0xfc   :  { %v302_v61 = vmax.f32 %v1572_v60, 0.0 }
  0xfd   :  { %v1575_v62 = vpop.f32.mrf.mxu0 }
  0xfe   :  { %v301_v63 = vmax.f32 %v1575_v62, 0.0 }
  0xff   :  { %v1578_v0 = vpop.f32.mrf.mxu0 }
 0x100   :  { %v304_v1 = vmax.f32 %v1578_v0, 0.0 }
 0x101   :  { %v1581_v2 = vpop.f32.mrf.mxu0 }
 0x102   :  { %v303_v3 = vmax.f32 %v1581_v2, 0.0 }
 0x103   :  { %v1584_v4 = vpop.f32.mrf.mxu0 }
 0x104   :  { %v306_v5 = vmax.f32 %v1584_v4, 0.0 }
 0x105   :  { %v1587_v6 = vpop.f32.mrf.mxu0 }
 0x106   :  { %v305_v7 = vmax.f32 %v1587_v6, 0.0 }
 0x108   :  { %1310 = vtanh.f32 %v305_v7 }
 0x109   :  { %1378 = dma.done.wait [#allocation3], 1024 }
 0x10a   :  { %1379 = vsyncadd [#allocation3], 4294966272  ;;  %1312 = vtanh.f32 %v306_v5  ;;  %v1294_v8 = vld [vmem:[#allocation2] sm:$0xff]   ;;  %v1302_v13 = vld [vmem:[%s1732_s4 + $0x38] sm:$0xff]   ;;  %vm1381_vm0 = vmmov 0  }
 0x10b   :  { %1314 = vtanh.f32 %v303_v3  ;;  %1174 = vmatprep.mubr.bf16.mxu1 %v1294_v8  ;;  %v1303_v15 = vld [vmem:[%s1732_s4 + $0x30] sm:$0xff]   ;;  %1190 = vmatprep.subr.bf16.mxu0 %v1302_v13  ;;  %v1295_v35 = vld [vmem:[#allocation2 + $0x8] sm:$0xff]   ;;  %v1297_v37 = vld [vmem:[#allocation2 + $0x18] sm:$0xff]  }
 0x10c   :  { %1316 = vtanh.f32 %v304_v1  ;;  %1191 = vmatpush3.bf16.msra.mxu0 %v1302_v13  ;;  %v1296_v36 = vld [vmem:[#allocation2 + $0x10] sm:$0xff]   ;;  %v1298_v38 = vld [vmem:[#allocation2 + $0x20] sm:$0xff]   ;;  %v1299_v39 = vld [vmem:[#allocation2 + $0x28] sm:$0xff]  }
 0x10d   :  { %1318 = vtanh.f32 %v301_v63  ;;  %1192 = vmatprep.subr.bf16.mxu0 %v1303_v15 }
 0x10e   :  { %1320 = vtanh.f32 %v302_v61 }
 0x10f   :  { %1322 = vtanh.f32 %v299_v59 }
 0x110   :  { %1324 = vtanh.f32 %v300_v57  ;;  %1193 = vmatpush3.bf16.msra.mxu0 %v1303_v15 }
 0x111   :  { %1326 = vtanh.f32 %v297_v55  ;;  %v1309_v55 = vld [vmem:[%s1732_s4] sm:$0xff]  }
 0x112   :  { %1328 = vtanh.f32 %v298_v53  ;;  %v1308_v53 = vld [vmem:[%s1732_s4 + $0x8] sm:$0xff]  }
 0x113   :  { %1330 = vtanh.f32 %v295_v51  ;;  %v1307_v51 = vld [vmem:[%s1732_s4 + $0x10] sm:$0xff]  }
 0x114   :  { %1332 = vtanh.f32 %v296_v49  ;;  %v1306_v49 = vld [vmem:[%s1732_s4 + $0x18] sm:$0xff]  }
 0x115   :  { %v1311_v9 = vpop.eup %1310  ;;  %1334 = vtanh.f32 %v293_v47  ;;  %v1305_v47 = vld [vmem:[%s1732_s4 + $0x20] sm:$0xff]  }
 0x116   :  { %1336 = vtanh.f32 %v294_v45  ;;  %v1304_v45 = vld [vmem:[%s1732_s4 + $0x28] sm:$0xff]  }
 0x117   :  { %v1313_v10 = vpop.eup %1312  ;;  %1338 = vtanh.f32 %v291_v43  ;;  %v1301_v43 = vld [vmem:[#allocation2 + $0x38] sm:$0xff]   ;;  %1194 = vmatprep.subr.bf16.mxu0 %v1304_v45 }
 0x118   :  { %v1315_v11 = vpop.eup %1314  ;;  %v366_v12 = vpack.c.bf16 %v1313_v10, %v1311_v9  ;;  %1340 = vtanh.f32 %v292_v41  ;;  %v1300_v41 = vld [vmem:[#allocation2 + $0x30] sm:$0xff]   ;;  %1195 = vmatpush3.bf16.msra.mxu0 %v1304_v45 }
 0x119   :  { %v1317_v14 = vpop.eup %1316  ;;  %1196 = vmatprep.subr.bf16.mxu0 %v1305_v47  ;;  %v878_v45 = vld [vmem:[%s1733_s5 + $0x70] sm:$0xff] }
 0x11a   :  { %v1319_v16 = vpop.eup %1318  ;;  %1158 = vmatprep.subr.bf16.mxu1 %v366_v12  ;;  %v365_v17 = vpack.c.bf16 %v1317_v14, %v1315_v11 }
 0x11b   :  { %v1321_v18 = vpop.eup %1320  ;;  %1159 = vmatpush3.bf16.msra.mxu1 %v366_v12 }
 0x11c   :  { %v1323_v19 = vpop.eup %1322  ;;  %1160 = vmatprep.subr.bf16.mxu1 %v365_v17  ;;  %v364_v20 = vpack.c.bf16 %v1321_v18, %v1319_v16  ;;  %1197 = vmatpush3.bf16.msra.mxu0 %v1305_v47  ;;  %v877_v47 = vld [vmem:[%s1733_s5 + $0x68] sm:$0xff] }
 0x11d   :  { %v1325_v21 = vpop.eup %1324  ;;  %1198 = vmatprep.subr.bf16.mxu0 %v1306_v49 }
 0x11e   :  { %v1327_v22 = vpop.eup %1326  ;;  %v363_v23 = vpack.c.bf16 %v1325_v21, %v1323_v19 }
 0x11f   :  { %1161 = vmatpush3.bf16.msra.mxu1 %v365_v17  ;;  %v1329_v24 = vpop.eup %1328 }
 0x120   :  { %1162 = vmatprep.subr.bf16.mxu1 %v364_v20  ;;  %v1331_v25 = vpop.eup %1330  ;;  %v362_v26 = vpack.c.bf16 %v1329_v24, %v1327_v22  ;;  %1199 = vmatpush3.bf16.msra.mxu0 %v1306_v49  ;;  %v876_v49 = vld [vmem:[%s1733_s5 + $0x60] sm:$0xff] }
 0x121   :  { %v1333_v27 = vpop.eup %1332  ;;  %1200 = vmatprep.subr.bf16.mxu0 %v1307_v51 }
 0x122   :  { %v1335_v28 = vpop.eup %1334  ;;  %v361_v29 = vpack.c.bf16 %v1333_v27, %v1331_v25 }
 0x123   :  { %1163 = vmatpush3.bf16.msra.mxu1 %v364_v20  ;;  %v1337_v30 = vpop.eup %1336 }
 0x124   :  { %1164 = vmatprep.subr.bf16.mxu1 %v363_v23  ;;  %v1339_v31 = vpop.eup %1338  ;;  %v360_v32 = vpack.c.bf16 %v1337_v30, %v1335_v28  ;;  %1201 = vmatpush3.bf16.msra.mxu0 %v1307_v51  ;;  %v875_v51 = vld [vmem:[%s1733_s5 + $0x58] sm:$0xff] }
 0x125   :  { %v1341_v33 = vpop.eup %1340  ;;  %1202 = vmatprep.subr.bf16.mxu0 %v1308_v53 }
 0x126   :  { %v359_v34 = vpack.c.bf16 %v1341_v33, %v1339_v31 }
 0x127   :  { %1165 = vmatpush3.bf16.msra.mxu1 %v363_v23 }
 0x128   :  { %1166 = vmatprep.subr.bf16.mxu1 %v362_v26  ;;  %1203 = vmatpush3.bf16.msra.mxu0 %v1308_v53  ;;  %v874_v53 = vld [vmem:[%s1733_s5 + $0x50] sm:$0xff] }
 0x129   :  { %1204 = vmatprep.subr.bf16.mxu0 %v1309_v55 }
 0x12b   :  { %1167 = vmatpush3.bf16.msra.mxu1 %v362_v26 }
 0x12c   :  { %1168 = vmatprep.subr.bf16.mxu1 %v361_v29  ;;  %1205 = vmatpush3.bf16.msra.mxu0 %v1309_v55  ;;  %v873_v55 = vld [vmem:[%s1733_s5 + $0x48] sm:$0xff] }
 0x12f   :  { %1169 = vmatpush3.bf16.msra.mxu1 %v361_v29 }
 0x130   :  { %1170 = vmatprep.subr.bf16.mxu1 %v360_v32 }
 0x133   :  { %1171 = vmatpush3.bf16.msra.mxu1 %v360_v32 }
 0x134   :  { %1172 = vmatprep.subr.bf16.mxu1 %v359_v34 }
 0x137   :  { %1173 = vmatpush3.bf16.msra.mxu1 %v359_v34 }
 0x13a   :  { %1175 = vmatmul.mubr.bf16.vlgmr.msra.gmra.mxu1 %v1295_v35 }
 0x13b   :  { %1178 = vmatprep.mubr.bf16.mxu1 %v1296_v36 }
 0x142   :  { %1179 = vmatmul.mubr.bf16.gmra.mxu1 %v1297_v37 }
 0x143   :  { %1182 = vmatprep.mubr.bf16.mxu1 %v1298_v38 }
 0x14a   :  { %1183 = vmatmul.mubr.bf16.gmra.mxu1 %v1299_v39 }
 0x14b   :  { %1186 = vmatprep.mubr.bf16.mxu1 %v1300_v41  ;;  %v1380_v41 = vmov 0.0  }
 0x14c   :  { %1222 = vmatprep.subr.mxu1 %v1380_v41  ;;  %1257 = vmatprep.subr.mxu0 %v1380_v41 }
 0x152   :  { %1187 = vmatmul.mubr.bf16.gmra.mxu1 %v1301_v43  ;;  %v879_v43 = vld [vmem:[%s1733_s5 + $0x78] sm:$0xff] }
 0x153   :  { %1254 = vmatprep.mubr.msk.f32.mxu1 %vm1381_vm0, %v1380_v41 }
 0x1fa   :  { %v1176_v57 = vpop.f32.mrf.mxu1 }
 0x1fc   :  { %v465_v59 = vpop.f32.mrf.mxu1 }
 0x1fd   :  { %1342 = vtanh.f32 %v465_v59  ;;  %v871_v59 = vld [vmem:[%s1733_s5 + $0x38] sm:$0xff] }
 0x1fe   :  { %v1177_v61 = vpop.f32.mrf.mxu1 }
 0x1ff   :  { %1344 = vtanh.f32 %v1177_v61  ;;  %v870_v61 = vld [vmem:[%s1733_s5 + $0x30] sm:$0xff] }
 0x200   :  { %v468_v63 = vpop.f32.mrf.mxu1 }
 0x201   :  { %1346 = vtanh.f32 %v468_v63  ;;  %v869_v63 = vld [vmem:[%s1733_s5 + $0x28] sm:$0xff] }
 0x202   :  { %1348 = vtanh.f32 %v1176_v57  ;;  %v1180_v1 = vpop.f32.mrf.mxu1  ;;  %v872_v57 = vld [vmem:[%s1733_s5 + $0x40] sm:$0xff] }
 0x204   :  { %v481_v3 = vpop.f32.mrf.mxu1 }
 0x205   :  { %1350 = vtanh.f32 %v481_v3  ;;  %v867_v3 = vld [vmem:[%s1733_s5 + $0x18] sm:$0xff] }
 0x206   :  { %v1181_v5 = vpop.f32.mrf.mxu1 }
 0x207   :  { %1352 = vtanh.f32 %v1181_v5  ;;  %v866_v5 = vld [vmem:[%s1733_s5 + $0x10] sm:$0xff] }
 0x208   :  { %v484_v7 = vpop.f32.mrf.mxu1 }
 0x209   :  { %1354 = vtanh.f32 %v484_v7  ;;  %v865_v7 = vld [vmem:[%s1733_s5 + $0x8] sm:$0xff] }
 0x20a   :  { %1356 = vtanh.f32 %v1180_v1  ;;  %v1184_v8 = vpop.f32.mrf.mxu1  ;;  %v1343_v9 = vpop.eup %1342  ;;  %v868_v1 = vld [vmem:[%s1733_s5 + $0x20] sm:$0xff] }
 0x20c   :  { %v497_v10 = vpop.f32.mrf.mxu1  ;;  %v1345_v11 = vpop.eup %1344 }
 0x20d   :  { %1358 = vtanh.f32 %v497_v10 }
 0x20e   :  { %v1347_v12 = vpop.eup %1346  ;;  %v1185_v13 = vpop.f32.mrf.mxu1 }
 0x20f   :  { %v1349_v14 = vpop.eup %1348  ;;  %v544_v15 = vpack.c.bf16 %v1347_v12, %v1343_v9  ;;  %1360 = vtanh.f32 %v1185_v13 }
 0x210   :  { %v500_v16 = vpop.f32.mrf.mxu1  ;;  %v545_v17 = vpack.c.bf16 %v1345_v11, %v1349_v14 }
 0x211   :  { %1362 = vtanh.f32 %v500_v16  ;;  %1206 = vmatprep.mubr.bf16.mxu0 %v544_v15 }
 0x212   :  { %1364 = vtanh.f32 %v1184_v8  ;;  %v1188_v18 = vpop.f32.mrf.mxu1  ;;  %1207 = vmatmul.mubr.bf16.vlgmr.msra.gmra.mxu0 %v545_v17  ;;  %v1351_v19 = vpop.eup %1350 }
 0x213   :  { %1258 = vmatpush3.msra.mxu0 %v879_v43 }
 0x214   :  { %v513_v20 = vpop.f32.mrf.mxu1  ;;  %v1353_v21 = vpop.eup %1352  ;;  %1259 = vmatprep.subr.mxu0 %v1380_v41 }
 0x215   :  { %1366 = vtanh.f32 %v513_v20  ;;  %1260 = vmatpush3.msra.mxu0 %v878_v45 }
 0x216   :  { %v1355_v22 = vpop.eup %1354  ;;  %v1189_v23 = vpop.f32.mrf.mxu1  ;;  %1261 = vmatprep.subr.mxu0 %v1380_v41 }
 0x217   :  { %v1357_v24 = vpop.eup %1356  ;;  %v546_v25 = vpack.c.bf16 %v1355_v22, %v1351_v19  ;;  %1368 = vtanh.f32 %v1189_v23  ;;  %1262 = vmatpush3.msra.mxu0 %v877_v47 }
 0x218   :  { %v516_v26 = vpop.f32.mrf.mxu1  ;;  %v547_v27 = vpack.c.bf16 %v1353_v21, %v1357_v24  ;;  %1263 = vmatprep.subr.mxu0 %v1380_v41 }
 0x219   :  { %1370 = vtanh.f32 %v516_v26  ;;  %1210 = vmatprep.mubr.bf16.mxu0 %v546_v25  ;;  %1264 = vmatpush3.msra.mxu0 %v876_v49 }
 0x21a   :  { %1372 = vtanh.f32 %v1188_v18  ;;  %1211 = vmatmul.mubr.bf16.gmra.mxu0 %v547_v27  ;;  %v1359_v28 = vpop.eup %1358  ;;  %1265 = vmatprep.subr.mxu0 %v1380_v41 }
 0x21b   :  { %1266 = vmatpush3.msra.mxu0 %v875_v51  ;;  %v1002_v51 = vld [vmem:[%s1734_s6] ss:$0 sm:$0xff] }
 0x21c   :  { %v1361_v29 = vpop.eup %1360  ;;  %1267 = vmatprep.subr.mxu0 %v1380_v41 }
 0x21d   :  { %1268 = vmatpush3.msra.mxu0 %v874_v53 }
 0x21e   :  { %v1363_v30 = vpop.eup %1362  ;;  %1269 = vmatprep.subr.mxu0 %v1380_v41 }
 0x21f   :  { %v1365_v31 = vpop.eup %1364  ;;  %v548_v32 = vpack.c.bf16 %v1363_v30, %v1359_v28  ;;  %1270 = vmatpush3.msra.mxu0 %v873_v55 }
 0x220   :  { %v549_v33 = vpack.c.bf16 %v1361_v29, %v1365_v31  ;;  %1271 = vmatprep.subr.mxu0 %v1380_v41 }
 0x221   :  { %1214 = vmatprep.mubr.bf16.mxu0 %v548_v32  ;;  %1272 = vmatpush3.msra.mxu0 %v872_v57 }
 0x222   :  { %1215 = vmatmul.mubr.bf16.gmra.mxu0 %v549_v33  ;;  %v1367_v34 = vpop.eup %1366  ;;  %1273 = vmatprep.subr.mxu0 %v1380_v41 }
 0x223   :  { %1274 = vmatpush3.msra.mxu0 %v871_v59 }
 0x224   :  { %v1369_v35 = vpop.eup %1368  ;;  %1275 = vmatprep.subr.mxu0 %v1380_v41 }
 0x225   :  { %1276 = vmatpush3.msra.mxu0 %v870_v61 }
 0x226   :  { %v1371_v36 = vpop.eup %1370  ;;  %1277 = vmatprep.subr.mxu0 %v1380_v41 }
 0x227   :  { %v1373_v37 = vpop.eup %1372  ;;  %v550_v38 = vpack.c.bf16 %v1371_v36, %v1367_v34  ;;  %1278 = vmatpush3.msra.mxu0 %v869_v63 }
 0x228   :  { %v551_v39 = vpack.c.bf16 %v1369_v35, %v1373_v37  ;;  %1279 = vmatprep.subr.mxu0 %v1380_v41 }
 0x229   :  { %1218 = vmatprep.mubr.bf16.mxu0 %v550_v38  ;;  %1280 = vmatpush3.msra.mxu0 %v868_v1 }
 0x22a   :  { %1219 = vmatmul.mubr.bf16.gmra.mxu0 %v551_v39  ;;  %1281 = vmatprep.subr.mxu0 %v1380_v41 }
 0x22b   :  { %1289 = vmatprep.mubr.msk.f32.mxu0 %vm1381_vm0, %v1380_v41  ;;  %1282 = vmatpush3.msra.mxu0 %v867_v3 }
 0x22c   :  { %1283 = vmatprep.subr.mxu0 %v1380_v41 }
 0x22d   :  { %1284 = vmatpush3.msra.mxu0 %v866_v5 }
 0x22e   :  { %1285 = vmatprep.subr.mxu0 %v1380_v41 }
 0x22f   :  { %1286 = vmatpush3.msra.mxu0 %v865_v7 }
 0x230   :  { %1287 = vmatprep.subr.mxu0 %v1380_v41 }
 0x2d2   :  { %v1208_v8 = vpop.f32.mrf.mxu0 }
 0x2d4   :  { %v1682_v9 = vpop.f32.mrf.mxu0 }
 0x2d6   :  { %v1209_v10 = vpop.f32.mrf.mxu0 }
 0x2d8   :  { %v669_v11 = vpop.f32.mrf.mxu0 }
 0x2d9   :  { %v730_v43 = vadd.f32 %v1542_v40, %v669_v11  ;;  %v777_v40 = vld [vmem:[%s1730_s2] sm:$0xff] }
 0x2da   :  { %v1212_v12 = vpop.f32.mrf.mxu0 }
 0x2db   :  { %v746_v45 = vmax.f32 %v730_v43, 0.0 }
 0x2dc   :  { %v682_v13 = vpop.f32.mrf.mxu0 }
 0x2dd   :  { %v733_v37 = vadd.f32 %v682_v13, %v1557_v50 }
 0x2de   :  { %v1213_v14 = vpop.f32.mrf.mxu0 }
 0x2df   :  { %v749_v39 = vmax.f32 %v733_v37, 0.0 }
 0x2e0   :  { %v685_v15 = vpop.f32.mrf.mxu0 }
 0x2e1   :  { %v734_v36 = vadd.f32 %v1554_v48, %v685_v15 }
 0x2e2   :  { %v1216_v16 = vpop.f32.mrf.mxu0 }
 0x2e3   :  { %v750_v38 = vmax.f32 %v734_v36, 0.0 }
 0x2e4   :  { %v698_v17 = vpop.f32.mrf.mxu0 }
 0x2e5   :  { %v737_v33 = vadd.f32 %v698_v17, %v1569_v58 }
 0x2e6   :  { %v1217_v18 = vpop.f32.mrf.mxu0 }
 0x2e7   :  { %v740_v30 = vadd.f32 %v1217_v18, %v1572_v60  ;;  %v736_v60 = vadd.f32 %v1213_v14, %v1560_v52  ;;  %v753_v35 = vmax.f32 %v737_v33, 0.0  ;;  %v732_v52 = vadd.f32 %v1209_v10, %v1548_v44 }
 0x2e8   :  { %v701_v19 = vpop.f32.mrf.mxu0  ;;  %v729_v44 = vadd.f32 %v1682_v9, %v1545_v42  ;;  %v864_v42 = vld [vmem:[%s1733_s5] sm:$0xff] }
 0x2e9   :  { %v748_v48 = vmax.f32 %v732_v52, 0.0  ;;  %1288 = vmatpush3.msra.mxu0 %v864_v42 }
 0x2ea   :  { %v1220_v20 = vpop.f32.mrf.mxu0 }
 0x2eb   :  { %v743_v23 = vadd.f32 %v1220_v20, %v1587_v6  ;;  %v739_v6 = vadd.f32 %v1216_v16, %v1575_v62  ;;  %v735_v62 = vadd.f32 %v1212_v12, %v1563_v54  ;;  %v731_v54 = vadd.f32 %v1208_v8, %v1551_v46 }
 0x2ec   :  { %v714_v21 = vpop.f32.mrf.mxu0  ;;  %v745_v46 = vmax.f32 %v729_v44, 0.0 }
 0x2ed   :  { %v759_v28 = vmax.f32 %v743_v23, 0.0  ;;  %v741_v29 = vadd.f32 %v714_v21, %v1581_v2  ;;  %v755_v2 = vmax.f32 %v739_v6, 0.0  ;;  %v751_v58 = vmax.f32 %v735_v62, 0.0 }
 0x2ee   :  { %v1221_v22 = vpop.f32.mrf.mxu0  ;;  %v747_v50 = vmax.f32 %v731_v54, 0.0 }
 0x2ef   :  { %v744_v24 = vadd.f32 %v1221_v22, %v1584_v4  ;;  %v757_v32 = vmax.f32 %v741_v29, 0.0  ;;  %v756_v4 = vmax.f32 %v740_v30, 0.0 }
 0x2f0   :  { %v717_v25 = vpop.f32.mrf.mxu0 }
 0x2f1   :  { %v760_v26 = vmax.f32 %v744_v24, 0.0  ;;  %v742_v27 = vadd.f32 %v1578_v0, %v717_v25  ;;  %v738_v0 = vadd.f32 %v1566_v56, %v701_v19  ;;  %v752_v56 = vmax.f32 %v736_v60, 0.0 }
 0x2f3   :  { %1223 = vmatpush3.msra.mxu1 %v760_v26  ;;  %v758_v31 = vmax.f32 %v742_v27, 0.0  ;;  %v754_v34 = vmax.f32 %v738_v0, 0.0 }
 0x2f4   :  { %1224 = vmatprep.subr.mxu1 %v1380_v41 }
 0x2f5   :  { %1225 = vmatpush3.msra.mxu1 %v759_v28 }
 0x2f6   :  { %1226 = vmatprep.subr.mxu1 %v1380_v41 }
 0x2f7   :  { %1227 = vmatpush3.msra.mxu1 %v758_v31 }
 0x2f8   :  { %1228 = vmatprep.subr.mxu1 %v1380_v41 }
 0x2f9   :  { %1229 = vmatpush3.msra.mxu1 %v757_v32 }
 0x2fa   :  { %1230 = vmatprep.subr.mxu1 %v1380_v41 }
 0x2fb   :  { %1231 = vmatpush3.msra.mxu1 %v756_v4 }
 0x2fc   :  { %1232 = vmatprep.subr.mxu1 %v1380_v41 }
 0x2fd   :  { %1233 = vmatpush3.msra.mxu1 %v755_v2 }
 0x2fe   :  { %1234 = vmatprep.subr.mxu1 %v1380_v41 }
 0x2ff   :  { %1235 = vmatpush3.msra.mxu1 %v754_v34 }
 0x300   :  { %1236 = vmatprep.subr.mxu1 %v1380_v41 }
 0x301   :  { %1237 = vmatpush3.msra.mxu1 %v753_v35 }
 0x302   :  { %1238 = vmatprep.subr.mxu1 %v1380_v41 }
 0x303   :  { %1239 = vmatpush3.msra.mxu1 %v752_v56 }
 0x304   :  { %1240 = vmatprep.subr.mxu1 %v1380_v41 }
 0x305   :  { %1241 = vmatpush3.msra.mxu1 %v751_v58 }
 0x306   :  { %1242 = vmatprep.subr.mxu1 %v1380_v41 }
 0x307   :  { %1243 = vmatpush3.msra.mxu1 %v750_v38 }
 0x308   :  { %1244 = vmatprep.subr.mxu1 %v1380_v41 }
 0x309   :  { %1245 = vmatpush3.msra.mxu1 %v749_v39 }
 0x30a   :  { %1246 = vmatprep.subr.mxu1 %v1380_v41 }
 0x30b   :  { %1247 = vmatpush3.msra.mxu1 %v748_v48 }
 0x30c   :  { %1248 = vmatprep.subr.mxu1 %v1380_v41 }
 0x30d   :  { %1249 = vmatpush3.msra.mxu1 %v747_v50 }
 0x30e   :  { %1250 = vmatprep.subr.mxu1 %v1380_v41 }
 0x30f   :  { %1251 = vmatpush3.msra.mxu1 %v746_v45 }
 0x310   :  { %1252 = vmatprep.subr.mxu1 %v1380_v41 }
 0x311   :  { %1253 = vmatpush3.msra.mxu1 %v745_v46 }
 0x312   :  { %1255 = vmatmul.mubr.f32.vlgmr.msra.gmra.mxu1 %v777_v40 }
 0x3d2   :  { %v860_v47 = vpop.f32.mrf.mxu1 }
 0x3d3   :  { %1290 = vmatmul.mubr.f32.vlgmr.msra.gmra.mxu0 %v860_v47 }
 0x3d4   :  { %v1256_v49 = vpop.f32.mrf.mxu1 }
 0x493   :  { %v953_v53 = vpop.f32.mrf.mxu0 }
 0x494   :  { %v954_v55 = vadd.f32 %v1002_v51, %v953_v53 }
 0x495   :  { %v1291_v57 = vpop.f32.mrf.mxu0 }
 0x496   :  { %957 = vmax.xlane.f32.xlu0 %v954_v55 }
 0x51f   :  { %v958_v59 = vpop.xlane.xlu0 %957 }
 0x520   :  { %v959_v41 = vsub.f32 %v954_v55, %v958_v59 }
 0x522   :  { %v960_v61 = vmul.f32 1.442695, %v959_v41 }
 0x524   :  { %1374 = vpow2.f32 %v960_v61 }
 0x531   :  { %v1375_v63 = vpop.eup %1374 }
 0x532   :  { %962 = vadd.xlane.f32.xlu0 %v1375_v63 }
 0x5bb   :  { %v963_v1 = vpop.xlane.xlu0 %962 }
 0x5bc   :  { %1376 = vlog2.f32 %v963_v1 }
 0x5c9   :  { %v1377_v3 = vpop.eup %1376 }
 0x5ca   :  { %v965_v5 = vmul.f32 0.6931472, %v1377_v3 }
 0x5cc   :  { %v966_v7 = vsub.f32 %v959_v41, %v965_v5 }
 0x5ce   :  { %967 = vst [vmem:[%s1735_s7] sm:$0xff] %v966_v7 }
 0x5cf   :  { %972 = vsyncmov [#allocation3] }
 0x5d2   :  { %s973_s6 = vpop.sfrf %972 }
 0x5d3   :  { %p1003_p0 = scmp.ne.s32.totalorder %s973_s6, 0 }
 0x5d5   :  { %977 = shalt.err (%p1003_p0)  }

</bundles_post_ra>
